<compile_context>
chip_gen: v5e
topology: v5e:2x2
jax: 0.10.0
libtpu: 0.0.40
codegen_flags: <defaults>
</compile_context>

<pallas_src>
import functools

import jax
import jax.numpy as jnp
import numpy as np
from jax.experimental import pallas as pl
from jax.experimental.pallas import tpu as pltpu


_TARGET_BLOCK_BYTES = 4 * 1024 * 1024   # ~4 MiB per stream block (>=85% HBM roofline);
                                         # 2x(in + out + pe) buffers stay well under
                                         # v7x's 64 MiB per-core VMEM.
_VMEM_LIMIT_BYTES = 40 * 1024 * 1024     # explicit scoped-VMEM budget (v5e default is
                                         # only 16 MiB; 40 MiB is legal on v5e/v6e/v7x).


# ---------------------------------------------------------------------------
# Kernel: pure streaming add of a (VMEM-resident) PE tile onto the input tile.
# ---------------------------------------------------------------------------
def _add_pe_kernel(x_ref, pe_ref, o_ref):
    # HBM-bandwidth bound; accumulate in f32, cast once on store.
    o_ref[...] = (x_ref[...].astype(jnp.float32)
                  + pe_ref[...].astype(jnp.float32)).astype(o_ref.dtype)


# ---------------------------------------------------------------------------
# PE table (identical to the PyTorch buffer construction), built host-side and
# cached — matches register_buffer semantics.
# ---------------------------------------------------------------------------
@functools.lru_cache(maxsize=None)
def _pe_table_np(seq_len, input_dim):
    position = np.arange(0, seq_len, dtype=np.float32)[:, None]                   # (S, 1)
    item = 1.0 / 10000.0 ** (np.arange(0, input_dim, 2, dtype=np.float32)
                             / input_dim)                                         # (D/2,)
    tmp_pos = position * item                                                     # (S, D/2)
    pe = np.zeros((seq_len, input_dim), dtype=np.float32)
    pe[:, 0::2] = np.sin(tmp_pos)
    pe[:, 1::2] = np.cos(tmp_pos)
    return pe                                                                     # (S, D) f32


_PE_DEVICE_CACHE = {}


def _pe_table(seq_len, input_dim, dtype):
    key = (seq_len, input_dim, jnp.dtype(dtype).name)
    if key not in _PE_DEVICE_CACHE:
        _PE_DEVICE_CACHE[key] = jnp.asarray(_pe_table_np(seq_len, input_dim), dtype=dtype)
    return _PE_DEVICE_CACHE[key]


# ---------------------------------------------------------------------------
# Wrapper
# ---------------------------------------------------------------------------
def position_encoding(x, max_seq_len=512):
    """x: (B, S, D). Returns x + PE[:S, :] broadcast over batch (PyTorch semantics)."""
    B, S, D = x.shape
    if S > max_seq_len:
        raise ValueError(f"seq_len {S} exceeds max_seq_len {max_seq_len}")
    if D % 2 != 0:
        raise ValueError("input_dim must be even (sin/cos interleave)")

    itemsize = jnp.dtype(x.dtype).itemsize
    # f32 inputs keep an f32 PE (bit-exact vs reference); bf16/f16 inputs get a
    # matching PE dtype to halve its (one-time) HBM read and VMEM footprint.
    pe_dtype = x.dtype if itemsize < 4 else jnp.float32
    pe = _pe_table(S, D, pe_dtype)

    params = pltpu.CompilerParams(
        dimension_semantics=("parallel", "parallel"),
        vmem_limit_bytes=_VMEM_LIMIT_BYTES,
    )
    target_elems = max(128, _TARGET_BLOCK_BYTES // itemsize)

    if D < 128:
        # ---- Lane-dense path: flatten (S, D) -> S*D so the minor dim is a large
        # multiple of 128 (unmasked full-lane stores, even for long sequences).
        sd = S * D
        x2 = x.reshape(B, sd)
        pe2 = pe.reshape(1, sd)

        if sd * min(B, 8) * itemsize <= _TARGET_BLOCK_BYTES:
            # Whole flattened rows are cheap: tile over batch only.
            tsd = sd
            if B <= 8:
                tb = B                                            # full extent (legal block)
            else:
                max_rows = max(8, target_elems // sd)
                tb = max(8, (min(max_rows, B // 2) // 8) * 8)     # >=2 grid steps (megacore)
        else:
            # Long rows: small batch block, tile the flattened lane axis in
            # multiples of 128 (grid along sd is then always >= 2).
            tb = B if B <= 8 else 8
            tsd = max(128, ((target_elems // tb) // 128) * 128)

        grid = (pl.cdiv(sd, tsd), pl.cdiv(B, tb))                 # batch = trailing (fast) axis
        out = pl.pallas_call(
            _add_pe_kernel,
            out_shape=jax.ShapeDtypeStruct((B, sd), x.dtype),
            grid=grid,
            in_specs=[
                pl.BlockSpec((tb, tsd), lambda j, b: (b, j)),
                # PE block index depends only on the leading axis -> constant
                # across the fast batch axis -> fetched from HBM once per tile.
                pl.BlockSpec((1, tsd), lambda j, b: (0, j)),
            ],
            out_specs=pl.BlockSpec((tb, tsd), lambda j, b: (b, j)),
            compiler_params=params,
        )(x2, pe2)
        return out.reshape(B, S, D)

    # ---- General path (D >= 128): keep D whole (already lane-dense), tile the
    # sequence, batch as the trailing grid axis so each PE tile is fetched once
    # per sequence tile — i.e. the whole PE table is read from HBM exactly once.
    if S * D <= target_elems or S <= 8:
        ts = S                                                    # full extent (legal block)
    else:
        ts = max(8, min(((target_elems // D) // 8) * 8, (S // 8) * 8))
    ns = pl.cdiv(S, ts)

    tb = max(1, min(target_elems // (S * D), B)) if ts == S else 1
    if ns * pl.cdiv(B, tb) < 2 and B >= 2:
        tb = max(1, B // 2)                                       # >=2 grid steps for megacore
    nb = pl.cdiv(B, tb)

    out = pl.pallas_call(
        _add_pe_kernel,
        out_shape=jax.ShapeDtypeStruct((B, S, D), x.dtype),
        grid=(ns, nb),
        in_specs=[
            pl.BlockSpec((tb, ts, D), lambda s, b: (b, s, 0)),
            pl.BlockSpec((ts, D), lambda s, b: (s, 0)),           # resident across batch steps
        ],
        out_specs=pl.BlockSpec((tb, ts, D), lambda s, b: (b, s, 0)),
        compiler_params=params,
    )(x, pe)
    return out


# ---------------------------------------------------------------------------
# Demo / self-check
# ---------------------------------------------------------------------------
if __name__ == "__main__":
    # Shapes implied by the module: batch=2, seq=8, hidden=32 (narrow-D path).
    B, S, D = 2, 8, 32
    x = jax.random.normal(jax.random.PRNGKey(0), (B, S, D), dtype=jnp.float32)
    out = jax.block_until_ready(position_encoding(x))
    ref = np.asarray(x) + _pe_table_np(512, D)[None, :S, :]
    np.testing.assert_allclose(np.asarray(out), ref, rtol=1e-5, atol=1e-5)

    # Also exercise the general (D >= 128) path with its resident-PE 2-D grid.
    B2, S2, D2 = 2, 16, 128
    x2 = jax.random.normal(jax.random.PRNGKey(1), (B2, S2, D2), dtype=jnp.float32)
    out2 = jax.block_until_ready(position_encoding(x2))
    ref2 = np.asarray(x2) + _pe_table_np(512, D2)[None, :S2, :]
    np.testing.assert_allclose(np.asarray(out2), ref2, rtol=1e-5, atol=1e-5)

    print("KERNEL_OK")
</pallas_src>

<mosaic_0001>
module attributes {stable_mosaic.version = 11 : i64} {
  func.func @_add_pe_kernel(%arg0: i32, %arg1: i32, %arg2: memref<2x256xf32, #tpu.memory_space<vmem>>, %arg3: memref<1x256xf32, #tpu.memory_space<vmem>>, %arg4: memref<2x256xf32, #tpu.memory_space<vmem>>) attributes {dimension_semantics = [#tpu.dimension_semantics<parallel>, #tpu.dimension_semantics<parallel>], iteration_bounds = array<i64: 1, 1>, scalar_prefetch = 0 : i64, scratch_operands = 0 : i64, tpu.core_type = #tpu.core_type<tc>, window_params = [{transform_indices = @transform_0, window_bounds = array<i64: 2, 256>}, {transform_indices = @transform_1, window_bounds = array<i64: 1, 256>}, {transform_indices = @transform_2, window_bounds = array<i64: 2, 256>}]} {
    %c0 = arith.constant 0 : index
    %c0_0 = arith.constant 0 : index
    %0 = vector.load %arg2[%c0, %c0_0] : memref<2x256xf32, #tpu.memory_space<vmem>>, vector<2x256xf32>
    %c0_1 = arith.constant 0 : index
    %c0_2 = arith.constant 0 : index
    %1 = vector.load %arg3[%c0_1, %c0_2] : memref<1x256xf32, #tpu.memory_space<vmem>>, vector<1x256xf32>
    %2 = vector.broadcast %1 : vector<1x256xf32> to vector<2x256xf32>
    %3 = arith.addf %0, %2 : vector<2x256xf32>
    %c0_3 = arith.constant 0 : index
    %c0_4 = arith.constant 0 : index
    %4 = vector.load %arg4[%c0_3, %c0_4] : memref<2x256xf32, #tpu.memory_space<vmem>>, vector<2x256xf32>
    tpu.vector_store %arg4[%c0_3, %c0_4], %3 {strides = array<i32>} : memref<2x256xf32, #tpu.memory_space<vmem>>, vector<2x256xf32>,
    return
  }
  func.func @transform_0(%arg0: i32, %arg1: i32) -> (i32, i32) {
    %c0_i32 = arith.constant 0 : i32
    return %arg1, %arg0 : i32, i32
  }
  func.func @transform_1(%arg0: i32, %arg1: i32) -> (i32, i32) {
    %c0_i32 = arith.constant 0 : i32
    %c0_i32_0 = arith.constant 0 : i32
    return %c0_i32, %arg0 : i32, i32
  }
  func.func @transform_2(%arg0: i32, %arg1: i32) -> (i32, i32) {
    %c0_i32 = arith.constant 0 : i32
    return %arg1, %arg0 : i32, i32
  }
}

</mosaic_0001>

<bundles_post_ra>
// kernel: tpu_custom_call.1
= control target key start
LH: loop header
LB: loop body
LE: loop exit
PB: predicated region body
PF: predicated region fallthrough
CT: control target
= control target key end

     0   :  { %7 = vsyncpa [#allocation3], 0  ;;  %s177_s0 = inlined_call_operand.hbm [shape: f32[2,256], index: 0, kind: input, shape index: {}]   ;;  %s178_s1 = inlined_call_operand.hbm [shape: f32[1,256], index: 1, kind: input, shape index: {}]   ;;  %s179_s2 = inlined_call_operand.hbm [shape: f32[2,256], index: 2, kind: output, shape index: {}]  }
   0x1   :  { %8 = vsyncpa [#allocation6], 0 }
   0x2   :  { %9 = vsyncpa [#allocation4], 0  ;;  %s15_s11 = sshll.u32 %s177_s0, 4  ;;  %s150_s12 = smov [#allocation2]   ;;  %s16_s11 = int_to_ptr.hbm [resolvable:$true] %s15_s11 }
   0x3   :  { %s17_s13 = sshll.u32 %s150_s12, 4  ;;  %s26_s16 = sshll.u32 %s178_s1, 4  ;;  %s18_s13 = int_to_ptr.vmem [resolvable:$true] %s17_s13  ;;  %s27_s16 = int_to_ptr.hbm [resolvable:$true] %s26_s16 }
   0x4   :  { %20 = dma.hbm_to_vmem [thread:$0]  %s16_s11, 64, %s18_s13, [#allocation3]  }
   0x5   :  { %s151_s17 = smov [#allocation5]  }
   0x6   :  { %s28_s18 = sshll.u32 %s151_s17, 4  ;;  %s29_s18 = int_to_ptr.vmem [resolvable:$true] %s28_s18 }
   0x7   :  { %31 = dma.hbm_to_vmem [thread:$0]  %s27_s16, 32, %s29_s18, [#allocation6]  }
   0x8   :  { %144 = dma.done.wait [#allocation3], 64  }
   0x9   :  { %145 = vsyncadd [#allocation3], 4294967232 }
   0xa   :  { %146 = dma.done.wait [#allocation6], 32  }
   0xb   :  { %147 = vsyncadd [#allocation6], 4294967264  ;;  %v41_v0 = vld [vmem:[#allocation5] sm:$0x3]  ;;  %vm46_vm0 = vcmask 1041408   ;;  %s152_s0 = smov [#allocation7]  }
   0xc   :  { %v43_v1 = vperm.slane %v41_v0, 0  ;;  %v44_v2 = vperm.slane %v41_v0, 1  ;;  %v40_v3 = vld [vmem:[#allocation2] sm:$0xf]  ;;  %s56_s19 = sshll.u32 %s152_s0, 4  ;;  %s58_s21 = sshll.u32 %s179_s2, 4  ;;  %s57_s19 = int_to_ptr.vmem [resolvable:$true] %s56_s19  ;;  %s59_s21 = int_to_ptr.hbm [resolvable:$true] %s58_s21 }
   0xe   :  { %v45_v4 = vrot.slane %v44_v2, 6 }
  0x10   :  { %v47_v5 = vsel %vm46_vm0, %v43_v1, %v45_v4 }
  0x11   :  { %v49_v6 = vadd.f32 %v47_v5, %v40_v3 }
  0x13   :  { %50 = vst [vmem:[#allocation7] sm:$0xf] %v49_v6 }
  0x14   :  { %61 = dma.vmem_to_hbm [thread:$0]  %s57_s19, 64, %s59_s21, [#allocation4]  }
  0x15   :  { %148 = dma.done.wait [#allocation4], 64  }
  0x16   :  { %149 = vsyncadd [#allocation4], 4294967232 }
  0x17   :  { %66 = vsyncpa [#allocation3], 1 }
  0x18   :  { %67 = vsyncpa [#allocation6], 1 }
  0x19   :  { %68 = vsyncpa [#allocation4], 1 }

</bundles_post_ra>
